<compile_context>
chip_gen: v5e
topology: v5e:2x2
jax: 0.10.0
libtpu: 0.0.40
codegen_flags: <defaults>
</compile_context>

<pallas_src>
import functools

import jax
import jax.numpy as jnp
from jax import lax
from jax.experimental import pallas as pl
from jax.experimental.pallas import tpu as pltpu


def _pick_tile(dim, pref, align):
    """Largest t <= pref with t % align == 0 and dim % t == 0; else full dim.

    Full-dim blocks are always layout-legal on TPU, so the fallback never pads.
    """
    if dim % align == 0:
        t = min(pref, dim)
        t -= t % align
        while t >= align:
            if dim % t == 0:
                return t
            t -= align
    return dim


def _flatten_head_kernel(x_ref, w_ref, b_ref, o_ref, acc_ref):
    # x_ref:   [tm, tk]   rows = (batch, var) pairs, flattened features
    # w_ref:   [tn, tk]   PyTorch Linear layout [out_features, in_features]
    # b_ref:   [1, tn]    f32 bias slice
    # o_ref:   [tm, tn]   output tile (resident across the K grid axis)
    # acc_ref: [tm, tn]   f32 accumulator scratch
    k = pl.program_id(2)

    @pl.when(k == 0)
    def _():
        acc_ref[...] = jnp.zeros_like(acc_ref)

    x_blk = x_ref[...].astype(w_ref.dtype)  # cheap VPU cast; x block is small
    acc_ref[...] += lax.dot_general(
        x_blk, w_ref[...],
        dimension_numbers=(((1,), (1,)), ((), ())),   # contract x[-1] with w[-1]
        preferred_element_type=jnp.float32)

    @pl.when(k == pl.num_programs(2) - 1)
    def _():
        o_ref[...] = (acc_ref[...] + b_ref[...]).astype(o_ref.dtype)


@functools.partial(
    jax.jit,
    static_argnames=("target_window", "block_m", "block_n", "block_k"))
def flatten_head_forward(x, weight, bias, *, target_window,
                         block_m=256, block_n=512, block_k=512):
    """x: [bs, n_vars, d_model, patch_num]; weight: [target_window, nf]; bias: [target_window]."""
    bs, n_vars, d_model, patch_num = x.shape
    nf = d_model * patch_num
    assert weight.shape == (target_window, nf)
    assert bias.shape == (target_window,)

    M, K, N = bs * n_vars, nf, target_window
    tm = _pick_tile(M, block_m, 8)
    tk = _pick_tile(K, block_k, 128)
    tn = _pick_tile(N, block_n, 128)

    # Flatten(start_dim=-2) + fold (bs, n_vars) into rows: contiguous reshape,
    # no data movement. No padding anywhere -> every operand read from HBM once.
    x2d = x.reshape(M, K)
    b2d = bias.reshape(1, N).astype(jnp.float32)

    grid = (M // tm, N // tn, K // tk)  # K reduction last

    out2d = pl.pallas_call(
        _flatten_head_kernel,
        out_shape=jax.ShapeDtypeStruct((M, N), x.dtype),
        grid_spec=pltpu.PrefetchScalarGridSpec(
            num_scalar_prefetch=0,
            grid=grid,
            in_specs=[
                pl.BlockSpec((tm, tk), lambda i, j, k: (i, k)),   # x
                pl.BlockSpec((tn, tk), lambda i, j, k: (j, k)),   # weight (dominant stream)
                pl.BlockSpec((1, tn), lambda i, j, k: (0, j)),    # bias
            ],
            out_specs=pl.BlockSpec((tm, tn), lambda i, j, k: (i, j)),
            scratch_shapes=[pltpu.VMEM((tm, tn), jnp.float32)],
        ),
        compiler_params=pltpu.CompilerParams(
            dimension_semantics=("parallel", "parallel", "arbitrary"),
        ),
        cost_estimate=pl.CostEstimate(
            flops=2 * M * K * N,
            transcendentals=0,
            bytes_accessed=(M * K * x.dtype.itemsize
                            + N * K * weight.dtype.itemsize
                            + N * 4
                            + M * N * x.dtype.itemsize),
        ),
    )(x2d, weight, b2d)

    return out2d.reshape(bs, n_vars, N)


def reference_forward(x, weight, bias):
    bs, n_vars, d_model, patch_num = x.shape
    z = x.reshape(bs, n_vars, d_model * patch_num)
    return jnp.einsum("bvn,tn->bvt", z, weight) + bias


if __name__ == "__main__":
    # Small shapes consistent with the module:
    #   bs=2, n_vars=4, d_model=16, patch_num=16 -> nf=256
    #   target_window=96 (typical PatchTST pred length)
    bs, n_vars, d_model, patch_num = 2, 4, 16, 16
    nf = d_model * patch_num
    target_window = 96

    key = jax.random.PRNGKey(0)
    kx, kw, kb = jax.random.split(key, 3)

    x = jax.random.normal(kx, (bs, n_vars, d_model, patch_num), dtype=jnp.float32)
    # Deterministic synthetic Linear(nf, target_window) parameters.
    weight = jax.random.normal(kw, (target_window, nf), dtype=jnp.float32) * 0.02
    bias = jax.random.normal(kb, (target_window,), dtype=jnp.float32) * 0.02

    # Parameter prep done ONCE outside the jitted hot path: stream the weight
    # as bf16 (halves the dominant HBM byte stream); bias stays f32,
    # accumulation is f32.
    weight_bf16 = jax.block_until_ready(weight.astype(jnp.bfloat16))

    out = flatten_head_forward(x, weight_bf16, bias, target_window=target_window)
    out = jax.block_until_ready(out)

    ref = reference_forward(x, weight, bias)
    assert out.shape == (bs, n_vars, target_window)
    # bf16 weight stream -> relaxed tolerance vs the pure-f32 reference.
    assert jnp.allclose(out, ref, atol=2e-2, rtol=2e-2), "mismatch vs reference"

    print("KERNEL_OK")
</pallas_src>

<mosaic_0001>
module attributes {stable_mosaic.version = 11 : i64} {
  func.func @_flatten_head_kernel(%arg0: i32, %arg1: i32, %arg2: i32, %arg3: memref<8x256xf32, #tpu.memory_space<vmem>>, %arg4: memref<96x256xbf16, #tpu.memory_space<vmem>>, %arg5: memref<1x96xf32, #tpu.memory_space<vmem>>, %arg6: memref<8x96xf32, #tpu.memory_space<vmem>>, %arg7: memref<8x96xf32, #tpu.memory_space<vmem>>) attributes {dimension_semantics = [#tpu.dimension_semantics<parallel>, #tpu.dimension_semantics<parallel>, #tpu.dimension_semantics<arbitrary>], iteration_bounds = array<i64: 1, 1, 1>, scalar_prefetch = 0 : i64, scratch_operands = 1 : i64, tpu.core_type = #tpu.core_type<tc>, window_params = [{transform_indices = @transform_0, window_bounds = array<i64: 8, 256>}, {transform_indices = @transform_1, window_bounds = array<i64: 96, 256>}, {transform_indices = @transform_2, window_bounds = array<i64: 1, 96>}, {transform_indices = @transform_3, window_bounds = array<i64: 8, 96>}]} {
    %c0_i32 = arith.constant 0 : i32
    %0 = arith.cmpi eq, %arg2, %c0_i32 : i32
    %1 = arith.extui %0 : i1 to i32
    %c0_i32_0 = arith.constant 0 : i32
    %2 = arith.cmpi ne, %1, %c0_i32_0 : i32
    scf.if %2 {
      %cst_10 = arith.constant 0.000000e+00 : f32
      %13 = vector.broadcast %cst_10 : f32 to vector<8x96xf32>
      %c0_11 = arith.constant 0 : index
      %c0_12 = arith.constant 0 : index
      %14 = vector.load %arg7[%c0_11, %c0_12] : memref<8x96xf32, #tpu.memory_space<vmem>>, vector<8x96xf32>
      tpu.vector_store %arg7[%c0_11, %c0_12], %13 {strides = array<i32>} : memref<8x96xf32, #tpu.memory_space<vmem>>, vector<8x96xf32>,
    } else {
    }
    %c0 = arith.constant 0 : index
    %c0_1 = arith.constant 0 : index
    %3 = vector.load %arg3[%c0, %c0_1] : memref<8x256xf32, #tpu.memory_space<vmem>>, vector<8x256xf32>
    %4 = arith.truncf %3 : vector<8x256xf32> to vector<8x256xbf16>
    %c0_2 = arith.constant 0 : index
    %c0_3 = arith.constant 0 : index
    %5 = vector.load %arg7[%c0_2, %c0_3] : memref<8x96xf32, #tpu.memory_space<vmem>>, vector<8x96xf32>
    %c0_4 = arith.constant 0 : index
    %c0_5 = arith.constant 0 : index
    %6 = vector.load %arg4[%c0_4, %c0_5] : memref<96x256xbf16, #tpu.memory_space<vmem>>, vector<96x256xbf16>
    %cst = arith.constant dense<0.000000e+00> : vector<8x96xf32>
    %7 = tpu.matmul %4, %6, %cst {dimension_numbers = #tpu.dot_dimension_numbers<[1], [1], [0], [0], [0, 0, 1, 0], [], []>} : vector<8x256xbf16>, vector<96x256xbf16>, vector<8x96xf32> -> vector<8x96xf32>
    %8 = arith.addf %5, %7 : vector<8x96xf32>
    %c0_6 = arith.constant 0 : index
    %c0_7 = arith.constant 0 : index
    %9 = vector.load %arg7[%c0_6, %c0_7] : memref<8x96xf32, #tpu.memory_space<vmem>>, vector<8x96xf32>
    tpu.vector_store %arg7[%c0_6, %c0_7], %8 {strides = array<i32>} : memref<8x96xf32, #tpu.memory_space<vmem>>, vector<8x96xf32>,
    %c0_i32_8 = arith.constant 0 : i32
    %10 = arith.cmpi eq, %arg2, %c0_i32_8 : i32
    %11 = arith.extui %10 : i1 to i32
    %c0_i32_9 = arith.constant 0 : i32
    %12 = arith.cmpi ne, %11, %c0_i32_9 : i32
    scf.if %12 {
      %c0_10 = arith.constant 0 : index
      %c0_11 = arith.constant 0 : index
      %13 = vector.load %arg7[%c0_10, %c0_11] : memref<8x96xf32, #tpu.memory_space<vmem>>, vector<8x96xf32>
      %c0_12 = arith.constant 0 : index
      %c0_13 = arith.constant 0 : index
      %14 = vector.load %arg5[%c0_12, %c0_13] : memref<1x96xf32, #tpu.memory_space<vmem>>, vector<1x96xf32>
      %15 = vector.broadcast %14 : vector<1x96xf32> to vector<8x96xf32>
      %16 = arith.addf %13, %15 : vector<8x96xf32>
      %c0_14 = arith.constant 0 : index
      %c0_15 = arith.constant 0 : index
      %17 = vector.load %arg6[%c0_14, %c0_15] : memref<8x96xf32, #tpu.memory_space<vmem>>, vector<8x96xf32>
      tpu.vector_store %arg6[%c0_14, %c0_15], %16 {strides = array<i32>} : memref<8x96xf32, #tpu.memory_space<vmem>>, vector<8x96xf32>,
    } else {
    }
    return
  }
  func.func @transform_0(%arg0: i32, %arg1: i32, %arg2: i32) -> (i32, i32) {
    %c0_i32 = arith.constant 0 : i32
    return %arg0, %arg2 : i32, i32
  }
  func.func @transform_1(%arg0: i32, %arg1: i32, %arg2: i32) -> (i32, i32) {
    %c0_i32 = arith.constant 0 : i32
    return %arg1, %arg2 : i32, i32
  }
  func.func @transform_2(%arg0: i32, %arg1: i32, %arg2: i32) -> (i32, i32) {
    %c0_i32 = arith.constant 0 : i32
    %c0_i32_0 = arith.constant 0 : i32
    return %c0_i32, %arg1 : i32, i32
  }
  func.func @transform_3(%arg0: i32, %arg1: i32, %arg2: i32) -> (i32, i32) {
    %c0_i32 = arith.constant 0 : i32
    return %arg0, %arg1 : i32, i32
  }
}

</mosaic_0001>

<bundles_post_ra>
// kernel: flatten_head_forward.1
= control target key start
LH: loop header
LB: loop body
LE: loop exit
PB: predicated region body
PF: predicated region fallthrough
CT: control target
= control target key end

     0   :  { %s352_s0 = inlined_call_operand.vmem [shape: f32[8,256], index: 0, kind: input, shape index: {}]   ;;  %s353_s1 = inlined_call_operand.vmem [shape: bf16[96,256], index: 1, kind: input, shape index: {}]   ;;  %s354_s2 = inlined_call_operand.vmem [shape: f32[1,96], index: 2, kind: input, shape index: {}]   ;;  %s355_s3 = inlined_call_operand.hbm [shape: f32[8,96], index: 3, kind: output, shape index: {}]  }
   0x1   :  { %v196_v0 = vld [vmem:[%s353_s1 + $0x50] sm:$0xf]  ;;  %v213_v1 = vld [vmem:[%s353_s1 + $0x54] sm:$0xf0]  ;;  %v212_v2 = vld [vmem:[%s353_s1 + $0x54] sm:$0xf] }
   0x2   :  { %v197_v3 = vor.u32 %v213_v1, %v196_v0  ;;  %v198_v4 = vld [vmem:[%s353_s1 + $0x58] sm:$0xf0]  ;;  %v188_v6 = vld [vmem:[%s353_s1 + $0x40] sm:$0xf]  ;;  %v211_v7 = vld [vmem:[%s353_s1 + $0x44] sm:$0xf0] }
   0x3   :  { %v201_v5 = vor.u32 %v212_v2, %v198_v4  ;;  %v210_v8 = vld [vmem:[%s353_s1 + $0x44] sm:$0xf]  ;;  %v190_v9 = vld [vmem:[%s353_s1 + $0x48] sm:$0xf0]  ;;  %v189_v10 = vor.u32 %v211_v7, %v188_v6 }
   0x4   :  { %101 = vmatpush.bf16.xpose.msra.mxu0 %v197_v3 }
   0x5   :  { %114 = vmatpush.bf16.xpose.msra.mxu1 %v201_v5 }
   0x6   :  { %8 = vsyncpa [#allocation4], 0  ;;  %v193_v11 = vor.u32 %v210_v8, %v190_v9  ;;  %v180_v12 = vld [vmem:[%s353_s1 + $0x30] sm:$0xf]  ;;  %v209_v13 = vld [vmem:[%s353_s1 + $0x34] sm:$0xf0] }
   0x7   :  { %v208_v14 = vld [vmem:[%s353_s1 + $0x34] sm:$0xf]  ;;  %v182_v15 = vld [vmem:[%s353_s1 + $0x38] sm:$0xf0]  ;;  %v181_v16 = vor.u32 %v209_v13, %v180_v12  ;;  %v172_v18 = vld [vmem:[%s353_s1 + $0x20] sm:$0xf] }
   0x8   :  { %v185_v17 = vor.u32 %v208_v14, %v182_v15  ;;  %v207_v19 = vld [vmem:[%s353_s1 + $0x24] sm:$0xf0]  ;;  %v206_v20 = vld [vmem:[%s353_s1 + $0x24] sm:$0xf]  ;;  %v174_v21 = vld [vmem:[%s353_s1 + $0x28] sm:$0xf0] }
   0x9   :  { %v173_v22 = vor.u32 %v207_v19, %v172_v18  ;;  %v177_v23 = vor.u32 %v206_v20, %v174_v21  ;;  %v164_v24 = vld [vmem:[%s353_s1 + $0x10] sm:$0xf]  ;;  %v205_v25 = vld [vmem:[%s353_s1 + $0x14] sm:$0xf0]  ;;  %v204_v26 = vld [vmem:[%s353_s1 + $0x14] sm:$0xf] }
   0xa   :  { %v166_v27 = vld [vmem:[%s353_s1 + $0x18] sm:$0xf0]  ;;  %v165_v28 = vor.u32 %v205_v25, %v164_v24  ;;  %v156_v30 = vld [vmem:[%s353_s1] sm:$0xf]  ;;  %v203_v31 = vld [vmem:[%s353_s1 + $0x4] sm:$0xf0] }
   0xb   :  { %v169_v29 = vor.u32 %v204_v26, %v166_v27  ;;  %v202_v32 = vld [vmem:[%s353_s1 + $0x4] sm:$0xf]  ;;  %v158_v33 = vld [vmem:[%s353_s1 + $0x8] sm:$0xf0]  ;;  %v157_v34 = vor.u32 %v203_v31, %v156_v30  ;;  %vm20_vm0 = vcmask 785408   ;;  %v243_v40 = vmov 0.0  }
   0xc   :  { %102 = vmatpush.bf16.xpose.msra.mxu0 %v189_v10  ;;  %v161_v35 = vor.u32 %v202_v32, %v158_v33  ;;  %v22_v36 = vld [vmem:[%s352_s0] sm:$0xff]  ;;  %v23_v37 = vld [vmem:[%s352_s0 + $0x8] sm:$0xff]  ;;  %21 = vst.msk [vmem:[#allocation2] sm:$0xff] %vm20_vm0, %v243_v40  ;;  %s244_s0 = smov [#allocation3]   ;;  %s145_s14 = sshll.u32 %s355_s3, 4  ;;  %s146_s14 = int_to_ptr.hbm [resolvable:$true] %s145_s14 }
   0xd   :  { %115 = vmatpush.bf16.xpose.msra.mxu1 %v193_v11  ;;  %v24_v38 = vpack.c.bf16 %v22_v36, %v22_v36  ;;  %v25_v39 = vpack.c.bf16 %v23_v37, %v23_v37  ;;  %v216_v48 = vld [vmem:[%s354_s2] ss:$0 sm:$0xff]  ;;  %s143_s11 = sshll.u32 %s244_s0, 4  ;;  %s144_s11 = int_to_ptr.vmem [resolvable:$true] %s143_s11 }
  0x13   :  { %v26_v42 = vld [vmem:[#allocation2] sm:$0xff] }
  0x14   :  { %103 = vmatpush.bf16.xpose.msra.mxu0 %v181_v16 }
  0x15   :  { %116 = vmatpush.bf16.xpose.msra.mxu1 %v185_v17 }
  0x1c   :  { %104 = vmatpush.bf16.xpose.msra.mxu0 %v173_v22 }
  0x1d   :  { %117 = vmatpush.bf16.xpose.msra.mxu1 %v177_v23 }
  0x24   :  { %105 = vmatpush.bf16.xpose.msra.mxu0 %v165_v28 }
  0x25   :  { %118 = vmatpush.bf16.xpose.msra.mxu1 %v169_v29 }
  0x2c   :  { %106 = vmatpush.bf16.xpose.msra.mxu0 %v157_v34 }
  0x2d   :  { %119 = vmatpush.bf16.xpose.msra.mxu1 %v161_v35 }
  0x33   :  { %107 = vmatmul.bf16.vlgmr.msra.gmra.mxu0 %v24_v38 }
  0x34   :  { %120 = vmatmul.bf16.vlgmr.msra.gmra.mxu1 %v25_v39 }
  0xb0   :  { %v108_v41 = vpop.f32.mrf.mxu0 }
  0xb1   :  { %v121_v43 = vpop.f32.mrf.mxu1 }
  0xb2   :  { %v122_v44 = vadd.f32 %v121_v43, %v108_v41 }
  0xb4   :  { %v125_v45 = vadd.f32 %v122_v44, %v26_v42 }
  0xb6   :  { %127 = vst.msk [vmem:[#allocation2] sm:$0xff] %vm20_vm0, %v125_v45 }
  0xb8   :  { %v110_v46 = vpop.f32.mrf.mxu0 }
  0xb9   :  { %v123_v47 = vpop.f32.mrf.mxu1 }
  0xbd   :  { %v131_v49 = vld [vmem:[#allocation2] sm:$0xff] }
  0xbe   :  { %v136_v50 = vadd.f32 %v216_v48, %v131_v49 }
  0xc0   :  { %137 = vst.msk [vmem:[#allocation3] sm:$0xff] %vm20_vm0, %v136_v50 }
  0xc1   :  { %148 = dma.vmem_to_hbm [thread:$0]  %s144_s11, 128, %s146_s14, [#allocation4]  }
  0xc2   :  { %241 = dma.done.wait [#allocation4], 128  }
  0xc3   :  { %242 = vsyncadd [#allocation4], 4294967168 }
  0xc4   :  { %153 = vsyncpa [#allocation4], 1 }

</bundles_post_ra>
